<compile_context>
chip_gen: v7x
topology: tpu7x:2x2x1
jax: 0.10.0
libtpu: 0.0.40
codegen_flags: <defaults>
</compile_context>

<pallas_src>
import functools

import jax
import jax.numpy as jnp
from jax.experimental import pallas as pl
from jax.experimental.pallas import tpu as pltpu

# Logical dims from the PyTorch module.
F_IN = 1000    # backbone feature dim
H = 256        # l1 output dim
F_OUT = 1000   # l2 output dim

# Lane-dense padded dims (multiples of 128).
F_IN_P = 1024
F_OUT_P = 1024

DROP_P = 0.75
KEEP_P = 1.0 - DROP_P
KEEP_THRESH = int(KEEP_P * (1 << 24))   # integer-domain keep threshold


def _round_up(x, m):
    return (x + m - 1) // m * m


def classifier_head_kernel(x_ref, w1_ref, b1_ref, w2_ref, b2_ref, bits_ref,
                           o_ref, *, apply_dropout):
    # ---- l1: (TB, F_IN_P) bf16 @ (F_IN_P, H) bf16 -> f32 acc ---------------- #
    h = jnp.dot(x_ref[...], w1_ref[...], preferred_element_type=jnp.float32)
    h = h + b1_ref[...]                       # (TB, H) + (1, H)

    # ---- ReLU --------------------------------------------------------------- #
    h = jnp.maximum(h, 0.0)

    # ---- Dropout(p=0.75): keep w.p. 0.25, scale 1/0.25 (integer keep test) --- #
    if apply_dropout:
        keep = bits_ref[...] < jnp.int32(KEEP_THRESH)   # bits uniform in [0, 2^24)
        h = jnp.where(keep, h * jnp.float32(1.0 / KEEP_P), 0.0)

    # ---- l2: bf16 MXU inputs, f32 accumulation ------------------------------ #
    y = jnp.dot(h.astype(jnp.bfloat16), w2_ref[...],
                preferred_element_type=jnp.float32)
    y = y + b2_ref[...]                       # (TB, F_OUT_P) + (1, F_OUT_P)
    o_ref[...] = y.astype(o_ref.dtype)


def classifier_head(x, w1, b1, w2, b2, dropout_bits, *, training=True):
    """Fused classifier head.

    x:            (B, 1000) float32 backbone features
    w1:           (1000, 256)  (already transposed vs PyTorch: x @ w1 + b1)
    b1:           (256,)
    w2:           (256, 1000)
    b2:           (1000,)
    dropout_bits: (B, 256) int32 uniform in [0, 2**24)
    """
    B = x.shape[0]

    # Batch tile: multiple of 8 sublanes, capped at 128 rows per grid step.
    TB = min(_round_up(B, 8), 128)
    Bp = _round_up(B, TB)

    # Pad to lane-dense shapes; weights stored bf16 (halves HBM bytes).
    x_p = jnp.zeros((Bp, F_IN_P), jnp.bfloat16).at[:B, :F_IN].set(
        x.astype(jnp.bfloat16))
    w1_p = jnp.zeros((F_IN_P, H), jnp.bfloat16).at[:F_IN, :].set(
        w1.astype(jnp.bfloat16))
    b1_p = b1.reshape(1, H).astype(jnp.float32)
    w2_p = jnp.zeros((H, F_OUT_P), jnp.bfloat16).at[:, :F_OUT].set(
        w2.astype(jnp.bfloat16))
    b2_p = jnp.zeros((1, F_OUT_P), jnp.float32).at[:, :F_OUT].set(
        b2.reshape(1, F_OUT).astype(jnp.float32))
    bits_p = jnp.zeros((Bp, H), jnp.int32).at[:B, :].set(dropout_bits)

    kernel = functools.partial(classifier_head_kernel, apply_dropout=training)

    out_p = pl.pallas_call(
        kernel,
        out_shape=jax.ShapeDtypeStruct((Bp, F_OUT_P), jnp.float32),
        grid_spec=pltpu.PrefetchScalarGridSpec(
            num_scalar_prefetch=0,
            grid=(Bp // TB,),
            in_specs=[
                pl.BlockSpec((TB, F_IN_P),  lambda i: (i, 0)),   # x streams
                pl.BlockSpec((F_IN_P, H),   lambda i: (0, 0)),   # W1 resident
                pl.BlockSpec((1, H),        lambda i: (0, 0)),   # b1 resident
                pl.BlockSpec((H, F_OUT_P),  lambda i: (0, 0)),   # W2 resident
                pl.BlockSpec((1, F_OUT_P),  lambda i: (0, 0)),   # b2 resident
                pl.BlockSpec((TB, H),       lambda i: (i, 0)),   # dropout bits stream
            ],
            out_specs=pl.BlockSpec((TB, F_OUT_P), lambda i: (i, 0)),
        ),
        compiler_params=pltpu.CompilerParams(
            dimension_semantics=("parallel",)),   # batch tiles -> both TCs on v7x
    )(x_p, w1_p, b1_p, w2_p, b2_p, bits_p)

    return out_p[:B, :F_OUT]


if __name__ == "__main__":
    B = 2
    key = jax.random.PRNGKey(0)
    k_x, k_w1, k_b1, k_w2, k_b2, k_drop = jax.random.split(key, 6)

    # Synthetic backbone features standing in for EfficientNet-b3 output.
    x = jax.random.normal(k_x, (B, F_IN), dtype=jnp.float32)

    # PyTorch Linear-style uniform init bounds.
    bound1 = 1.0 / (F_IN ** 0.5)
    bound2 = 1.0 / (H ** 0.5)
    w1 = jax.random.uniform(k_w1, (F_IN, H),  jnp.float32, -bound1, bound1)
    b1 = jax.random.uniform(k_b1, (H,),       jnp.float32, -bound1, bound1)
    w2 = jax.random.uniform(k_w2, (H, F_OUT), jnp.float32, -bound2, bound2)
    b2 = jax.random.uniform(k_b2, (F_OUT,),   jnp.float32, -bound2, bound2)

    # Per-call dropout randomness (caller supplies a fresh key each step).
    bits = jax.random.randint(k_drop, (B, H), 0, 1 << 24, dtype=jnp.int32)

    out = classifier_head(x, w1, b1, w2, b2, bits, training=True)
    out = jax.block_until_ready(out)

    # Pure-JAX reference with identical bf16 weight quantization + dropout mask.
    h_ref = jnp.dot(x.astype(jnp.bfloat16), w1.astype(jnp.bfloat16),
                    preferred_element_type=jnp.float32) + b1
    h_ref = jnp.maximum(h_ref, 0.0)
    h_ref = jnp.where(bits < KEEP_THRESH, h_ref * (1.0 / KEEP_P), 0.0)
    y_ref = jnp.dot(h_ref.astype(jnp.bfloat16), w2.astype(jnp.bfloat16),
                    preferred_element_type=jnp.float32) + b2

    assert out.shape == (B, F_OUT) and out.dtype == jnp.float32
    assert jnp.allclose(out, y_ref, atol=1e-2, rtol=1e-2), \
        float(jnp.max(jnp.abs(out - y_ref)))
    print("KERNEL_OK")
</pallas_src>

<mosaic_0001>
module attributes {stable_mosaic.version = 11 : i64} {
  func.func @classifier_head_kernel(%arg0: i32, %arg1: memref<8x1024xbf16, #tpu.memory_space<vmem>>, %arg2: memref<1024x256xbf16, #tpu.memory_space<vmem>>, %arg3: memref<1x256xf32, #tpu.memory_space<vmem>>, %arg4: memref<256x1024xbf16, #tpu.memory_space<vmem>>, %arg5: memref<1x1024xf32, #tpu.memory_space<vmem>>, %arg6: memref<8x256xi32, #tpu.memory_space<vmem>>, %arg7: memref<8x1024xf32, #tpu.memory_space<vmem>>) attributes {dimension_semantics = [#tpu.dimension_semantics<parallel>], iteration_bounds = array<i64: 1>, scalar_prefetch = 0 : i64, scratch_operands = 0 : i64, tpu.core_type = #tpu.core_type<tc>, window_params = [{transform_indices = @transform_0, window_bounds = array<i64: 8, 1024>}, {pipeline_mode = #tpu.pipeline_mode<synchronous>, transform_indices = @transform_1, window_bounds = array<i64: 1024, 256>}, {pipeline_mode = #tpu.pipeline_mode<synchronous>, transform_indices = @transform_2, window_bounds = array<i64: 1, 256>}, {pipeline_mode = #tpu.pipeline_mode<synchronous>, transform_indices = @transform_3, window_bounds = array<i64: 256, 1024>}, {pipeline_mode = #tpu.pipeline_mode<synchronous>, transform_indices = @transform_4, window_bounds = array<i64: 1, 1024>}, {transform_indices = @transform_5, window_bounds = array<i64: 8, 256>}, {transform_indices = @transform_6, window_bounds = array<i64: 8, 1024>}]} {
    %c0 = arith.constant 0 : index
    %c0_0 = arith.constant 0 : index
    %0 = vector.load %arg1[%c0, %c0_0] : memref<8x1024xbf16, #tpu.memory_space<vmem>>, vector<8x1024xbf16>
    %c0_1 = arith.constant 0 : index
    %c0_2 = arith.constant 0 : index
    %1 = vector.load %arg2[%c0_1, %c0_2] : memref<1024x256xbf16, #tpu.memory_space<vmem>>, vector<1024x256xbf16>
    %cst = arith.constant dense<0.000000e+00> : vector<8x256xf32>
    %2 = tpu.matmul %0, %1, %cst {dimension_numbers = #tpu.dot_dimension_numbers<[1], [0], [0], [1], [0, 0, 1, 1], [], []>} : vector<8x1024xbf16>, vector<1024x256xbf16>, vector<8x256xf32> -> vector<8x256xf32>
    %c0_3 = arith.constant 0 : index
    %c0_4 = arith.constant 0 : index
    %3 = vector.load %arg3[%c0_3, %c0_4] : memref<1x256xf32, #tpu.memory_space<vmem>>, vector<1x256xf32>
    %4 = vector.broadcast %3 : vector<1x256xf32> to vector<8x256xf32>
    %5 = arith.addf %2, %4 : vector<8x256xf32>
    %cst_5 = arith.constant 0.000000e+00 : f32
    %6 = vector.broadcast %cst_5 : f32 to vector<8x256xf32>
    %7 = arith.maximumf %5, %6 : vector<8x256xf32>
    %c0_6 = arith.constant 0 : index
    %c0_7 = arith.constant 0 : index
    %8 = vector.load %arg6[%c0_6, %c0_7] : memref<8x256xi32, #tpu.memory_space<vmem>>, vector<8x256xi32>
    %c4194304_i32 = arith.constant 4194304 : i32
    %9 = vector.broadcast %c4194304_i32 : i32 to vector<8x256xi32>
    %10 = arith.cmpi slt, %8, %9 : vector<8x256xi32>
    %cst_8 = arith.constant 4.000000e+00 : f32
    %11 = vector.broadcast %cst_8 : f32 to vector<8x256xf32>
    %12 = arith.mulf %7, %11 : vector<8x256xf32>
    %cst_9 = arith.constant 0.000000e+00 : f32
    %13 = vector.broadcast %cst_9 : f32 to vector<8x256xf32>
    %14 = arith.select %10, %12, %13 : vector<8x256xi1>, vector<8x256xf32>
    %15 = arith.truncf %14 : vector<8x256xf32> to vector<8x256xbf16>
    %c0_10 = arith.constant 0 : index
    %c0_11 = arith.constant 0 : index
    %16 = vector.load %arg4[%c0_10, %c0_11] : memref<256x1024xbf16, #tpu.memory_space<vmem>>, vector<256x1024xbf16>
    %cst_12 = arith.constant dense<0.000000e+00> : vector<8x1024xf32>
    %17 = tpu.matmul %15, %16, %cst_12 {dimension_numbers = #tpu.dot_dimension_numbers<[1], [0], [0], [1], [0, 0, 1, 1], [], []>} : vector<8x256xbf16>, vector<256x1024xbf16>, vector<8x1024xf32> -> vector<8x1024xf32>
    %c0_13 = arith.constant 0 : index
    %c0_14 = arith.constant 0 : index
    %18 = vector.load %arg5[%c0_13, %c0_14] : memref<1x1024xf32, #tpu.memory_space<vmem>>, vector<1x1024xf32>
    %19 = vector.broadcast %18 : vector<1x1024xf32> to vector<8x1024xf32>
    %20 = arith.addf %17, %19 : vector<8x1024xf32>
    %c0_15 = arith.constant 0 : index
    %c0_16 = arith.constant 0 : index
    %21 = vector.load %arg7[%c0_15, %c0_16] : memref<8x1024xf32, #tpu.memory_space<vmem>>, vector<8x1024xf32>
    tpu.vector_store %arg7[%c0_15, %c0_16], %20 {strides = array<i32>} : memref<8x1024xf32, #tpu.memory_space<vmem>>, vector<8x1024xf32>,
    return
  }
  func.func @transform_0(%arg0: i32) -> (i32, i32) {
    %c0_i32 = arith.constant 0 : i32
    %c0_i32_0 = arith.constant 0 : i32
    return %arg0, %c0_i32 : i32, i32
  }
  func.func @transform_1(%arg0: i32) -> (i32, i32) {
    %c0_i32 = arith.constant 0 : i32
    %c0_i32_0 = arith.constant 0 : i32
    %c0_i32_1 = arith.constant 0 : i32
    return %c0_i32, %c0_i32_0 : i32, i32
  }
  func.func @transform_2(%arg0: i32) -> (i32, i32) {
    %c0_i32 = arith.constant 0 : i32
    %c0_i32_0 = arith.constant 0 : i32
    %c0_i32_1 = arith.constant 0 : i32
    return %c0_i32, %c0_i32_0 : i32, i32
  }
  func.func @transform_3(%arg0: i32) -> (i32, i32) {
    %c0_i32 = arith.constant 0 : i32
    %c0_i32_0 = arith.constant 0 : i32
    %c0_i32_1 = arith.constant 0 : i32
    return %c0_i32, %c0_i32_0 : i32, i32
  }
  func.func @transform_4(%arg0: i32) -> (i32, i32) {
    %c0_i32 = arith.constant 0 : i32
    %c0_i32_0 = arith.constant 0 : i32
    %c0_i32_1 = arith.constant 0 : i32
    return %c0_i32, %c0_i32_0 : i32, i32
  }
  func.func @transform_5(%arg0: i32) -> (i32, i32) {
    %c0_i32 = arith.constant 0 : i32
    %c0_i32_0 = arith.constant 0 : i32
    return %arg0, %c0_i32 : i32, i32
  }
  func.func @transform_6(%arg0: i32) -> (i32, i32) {
    %c0_i32 = arith.constant 0 : i32
    %c0_i32_0 = arith.constant 0 : i32
    return %arg0, %c0_i32 : i32, i32
  }
}

</mosaic_0001>

<bundles_post_ra>
// kernel: tpu_custom_call.1
= control target key start
LH: loop header
LB: loop body
LE: loop exit
PB: predicated region body
PF: predicated region fallthrough
CT: control target
= control target key end

     0   :  { %11 = vsyncpa [#allocation3], 0  ;;  %s2876_s0 = inlined_call_operand.hbm [shape: bf16[8,1024], index: 0, kind: input, shape index: {}]   ;;  %s2877_s1 = inlined_call_operand.hbm [shape: bf16[1024,256], index: 1, kind: input, shape index: {}]   ;;  %s2878_s2 = inlined_call_operand.vmem [shape: f32[1,256], index: 2, kind: input, shape index: {}]   ;;  %s2879_s3 = inlined_call_operand.hbm [shape: bf16[256,1024], index: 3, kind: input, shape index: {}]   ;;  %s2880_s4 = inlined_call_operand.hbm [shape: f32[1,1024], index: 4, kind: input, shape index: {}]   ;;  %s2881_s5 = inlined_call_operand.vmem [shape: s32[8,256], index: 5, kind: input, shape index: {}]   ;;  %s2882_s6 = inlined_call_operand.hbm [shape: f32[8,1024], index: 6, kind: output, shape index: {}]  }
   0x1   :  { %12 = vsyncpa [#allocation6], 0 }
   0x2   :  { %13 = vsyncpa [#allocation9], 0 }
   0x3   :  { %14 = vsyncpa [#allocation4], 0  ;;  %s2691_s21 = smov [#allocation5]   ;;  %s2573_s25 = scalar_lea.hbm %s2877_s1, 16384 }
   0x4   :  { %s30_s22 = sshll.u32 %s2691_s21, 4  ;;  %p2574_p0 = scmp.ne.s32.totalorder %s2877_s1, %s2573_s25  ;;  %s31_s22 = int_to_ptr.vmem [resolvable:$true] %s30_s22 }
   0x5   :  { %p2577_p1 = scmp.lt.u32.totalorder %s2573_s25, %s2877_s1 }
   0x7   :  { %p2579_p2 = pnand %p2577_p1, %p2574_p0 }
   0x9   :  { %2582 = shalt.err (!%p2579_p2)
}
   0xa   :  { %s2583_s30 = scalar_lea.vmem %s31_s22, 16384  ;;  %p2588_p4 = scmp.lt.s32.totalorder %s31_s22, %s31_s22 }
   0xb   :  { %p2584_p3 = scmp.ne.s32.totalorder %s31_s22, %s2583_s30  ;;  %p2589_p5 = scmp.lt.s32.totalorder %s2583_s30, %s2583_s30 }
   0xd   :  { %p2590_p6 = por %p2589_p5, %p2588_p4 }
   0xf   :  { %p2591_p7 = pnand %p2590_p6, %p2584_p3 }
  0x11   :  { %2594 = shalt.err (!%p2591_p7)
}
  0x12   :  { %s2692_s7 = smov 128   ;;  %s2693_s8 = smov 8  }
  0x13   :  { %36 = dma.hbm_to_vmem [thread:$0]  %s2877_s1, 16384, %s31_s22, [#allocation6], %s2692_s7, %s2692_s7, %s2693_s8  }
  0x14   :  { %s2694_s11 = smov [#allocation2]   ;;  %s2695_s13 = smov [#allocation7]  }
  0x15   :  { %s21_s12 = sshll.u32 %s2694_s11, 4  ;;  %s44_s14 = sshll.u32 %s2695_s13, 4  ;;  %s22_s12 = int_to_ptr.vmem [resolvable:$true] %s21_s12  ;;  %s45_s14 = int_to_ptr.vmem [resolvable:$true] %s44_s14 }
  0x16   :  { %s2595_s17 = scalar_lea.hbm %s2876_s0, 512 }
  0x17   :  { %p2596_p8 = scmp.ne.s32.totalorder %s2876_s0, %s2595_s17  ;;  %p2599_p9 = scmp.lt.u32.totalorder %s2595_s17, %s2876_s0 }
  0x19   :  { %p2601_p10 = pnand %p2599_p9, %p2596_p8 }
  0x1b   :  { %2604 = shalt.err (!%p2601_p10)
}
  0x1c   :  { %s2605_s1 = scalar_lea.vmem %s22_s12, 512  ;;  %p2610_p12 = scmp.lt.s32.totalorder %s22_s12, %s22_s12 }
  0x1d   :  { %p2606_p11 = scmp.ne.s32.totalorder %s22_s12, %s2605_s1  ;;  %p2611_p13 = scmp.lt.s32.totalorder %s2605_s1, %s2605_s1 }
  0x1f   :  { %p2612_p0 = por %p2611_p13, %p2610_p12 }
  0x21   :  { %p2613_p1 = pnand %p2612_p0, %p2606_p11 }
  0x23   :  { %2616 = shalt.err (!%p2613_p1)
}
  0x24   :  { %24 = dma.hbm_to_vmem [thread:$0]  %s2876_s0, 512, %s22_s12, [#allocation3]  }
  0x25   :  { %s2617_s26 = scalar_lea.hbm %s2879_s3, 16384 }
  0x26   :  { %p2618_p2 = scmp.ne.s32.totalorder %s2879_s3, %s2617_s26  ;;  %p2621_p3 = scmp.lt.u32.totalorder %s2617_s26, %s2879_s3 }
  0x28   :  { %p2623_p4 = pnand %p2621_p3, %p2618_p2 }
  0x2a   :  { %2626 = shalt.err (!%p2623_p4)
}
  0x2b   :  { %s2627_s7 = scalar_lea.vmem %s45_s14, 16384  ;;  %p2632_p6 = scmp.lt.s32.totalorder %s45_s14, %s45_s14 }
  0x2c   :  { %p2628_p5 = scmp.ne.s32.totalorder %s45_s14, %s2627_s7  ;;  %p2633_p7 = scmp.lt.s32.totalorder %s2627_s7, %s2627_s7 }
  0x2e   :  { %p2634_p8 = por %p2633_p7, %p2632_p6 }
  0x30   :  { %p2635_p9 = pnand %p2634_p8, %p2628_p5 }
  0x32   :  { %2638 = shalt.err (!%p2635_p9)
}
  0x33   :  { %s2696_s0 = smov 512   ;;  %s2697_s8 = smov 32  }
  0x34   :  { %50 = dma.hbm_to_vmem [thread:$0]  %s2879_s3, 16384, %s45_s14, [#allocation6], %s2696_s0, %s2696_s0, %s2697_s8  }
  0x35   :  { %s2698_s11 = smov [#allocation8]   ;;  %s2639_s16 = scalar_lea.hbm %s2880_s4, 128 }
  0x36   :  { %s57_s12 = sshll.u32 %s2698_s11, 4  ;;  %p2640_p10 = scmp.ne.s32.totalorder %s2880_s4, %s2639_s16  ;;  %s58_s12 = int_to_ptr.vmem [resolvable:$true] %s57_s12 }
  0x37   :  { %p2643_p11 = scmp.lt.u32.totalorder %s2639_s16, %s2880_s4 }
  0x39   :  { %p2645_p12 = pnand %p2643_p11, %p2640_p10 }
  0x3b   :  { %2648 = shalt.err (!%p2645_p12)
}
  0x3c   :  { %s2649_s21 = scalar_lea.vmem %s58_s12, 128  ;;  %p2654_p0 = scmp.lt.s32.totalorder %s58_s12, %s58_s12 }
  0x3d   :  { %p2650_p13 = scmp.ne.s32.totalorder %s58_s12, %s2649_s21  ;;  %p2655_p1 = scmp.lt.s32.totalorder %s2649_s21, %s2649_s21 }
  0x3f   :  { %p2656_p2 = por %p2655_p1, %p2654_p0 }
  0x41   :  { %p2657_p3 = pnand %p2656_p2, %p2650_p13 }
  0x43   :  { %2660 = shalt.err (!%p2657_p3)
}
  0x44   :  { %60 = dma.hbm_to_vmem [thread:$0]  %s2880_s4, 128, %s58_s12, [#allocation9]  }
  0x45   :  { %2683 = dma.done.wait [#allocation3], 512  }
  0x46   :  { %2684 = vsyncadd [#allocation3], 4294966784 }
  0x47   :  { %2685 = dma.done.wait [#allocation6], 32768  }
  0x48   :  { %2686 = vsyncadd [#allocation6], 4294934528 }
  0x49   :  { %2687 = dma.done.wait [#allocation9], 128  }
  0x4a   :  { %2688 = vsyncadd [#allocation9], 4294967168  ;;  %v2373_v0 = vld [vmem:[#allocation5 + $0x4] ss:$8 sps:$4 sm:$0xff]   ;;  %v2375_v1 = vld [vmem:[#allocation5] ss:$8 sps:$4 sm:$0xff]  }
  0x4b   :  { %887 = vmatprep.subr.bf16.mxu0 %v2373_v0  ;;  %v2376_v2 = vld [vmem:[#allocation5 + $0x14] ss:$8 sps:$4 sm:$0xff]   ;;  %v2378_v3 = vld [vmem:[#allocation5 + $0x10] ss:$8 sps:$4 sm:$0xff]   ;;  %v2379_v4 = vld [vmem:[#allocation5 + $0x24] ss:$8 sps:$4 sm:$0xff]  }
  0x4c   :  { %888 = vmatpush1.bf16.msra.mxu0 %v2375_v1  ;;  %v2381_v5 = vld [vmem:[#allocation5 + $0x20] ss:$8 sps:$4 sm:$0xff]   ;;  %v2382_v6 = vld [vmem:[#allocation5 + $0x34] ss:$8 sps:$4 sm:$0xff]   ;;  %v2384_v7 = vld [vmem:[#allocation5 + $0x30] ss:$8 sps:$4 sm:$0xff]  }
  0x4d   :  { %889 = vmatprep.subr.bf16.mxu0 %v2376_v2  ;;  %v2385_v8 = vld [vmem:[#allocation5 + $0x44] ss:$8 sps:$4 sm:$0xff]   ;;  %v2387_v9 = vld [vmem:[#allocation5 + $0x40] ss:$8 sps:$4 sm:$0xff]   ;;  %v2388_v10 = vld [vmem:[#allocation5 + $0x54] ss:$8 sps:$4 sm:$0xff]  }
  0x4e   :  { %v2390_v11 = vld [vmem:[#allocation5 + $0x50] ss:$8 sps:$4 sm:$0xff]   ;;  %v2391_v12 = vld [vmem:[#allocation5 + $0x64] ss:$8 sps:$4 sm:$0xff]   ;;  %v2393_v15 = vld [vmem:[#allocation5 + $0x60] ss:$8 sps:$4 sm:$0xff]  }
  0x4f   :  { %v75_v13 = vld [vmem:[#allocation2] sm:$0xff]  ;;  %v2394_v16 = vld [vmem:[#allocation5 + $0x74] ss:$8 sps:$4 sm:$0xff]   ;;  %v2396_v17 = vld [vmem:[#allocation5 + $0x70] ss:$8 sps:$4 sm:$0xff]  }
  0x50   :  { %890 = vmatpush1.bf16.msra.mxu0 %v2378_v3  ;;  %v2063_v14 = vcombine.high %v75_v13, %v75_v13  ;;  %v2397_v18 = vld [vmem:[#allocation5 + $0x84] ss:$8 sps:$4 sm:$0xff]   ;;  %v2399_v19 = vld [vmem:[#allocation5 + $0x80] ss:$8 sps:$4 sm:$0xff]   ;;  %v2400_v20 = vld [vmem:[#allocation5 + $0x94] ss:$8 sps:$4 sm:$0xff]   ;;  %v2062_v36 = vcombine.low %v75_v13, %v75_v13 }
  0x51   :  { %891 = vmatprep.subr.bf16.mxu0 %v2379_v4  ;;  %v2402_v21 = vld [vmem:[#allocation5 + $0x90] ss:$8 sps:$4 sm:$0xff]   ;;  %v2403_v22 = vld [vmem:[#allocation5 + $0xa4] ss:$8 sps:$4 sm:$0xff]   ;;  %v2405_v23 = vld [vmem:[#allocation5 + $0xa0] ss:$8 sps:$4 sm:$0xff]  }
  0x52   :  { %919 = vmatprep.mubr.bf16.mxu0 %v2063_v14  ;;  %v2406_v24 = vld [vmem:[#allocation5 + $0xb4] ss:$8 sps:$4 sm:$0xff]   ;;  %v2408_v25 = vld [vmem:[#allocation5 + $0xb0] ss:$8 sps:$4 sm:$0xff]   ;;  %v2409_v26 = vld [vmem:[#allocation5 + $0xc4] ss:$8 sps:$4 sm:$0xff]  }
  0x53   :  { %v2411_v27 = vld [vmem:[#allocation5 + $0xc0] ss:$8 sps:$4 sm:$0xff]   ;;  %v2412_v28 = vld [vmem:[#allocation5 + $0xd4] ss:$8 sps:$4 sm:$0xff]   ;;  %v2414_v29 = vld [vmem:[#allocation5 + $0xd0] ss:$8 sps:$4 sm:$0xff]  }
  0x54   :  { %892 = vmatpush1.bf16.msra.mxu0 %v2381_v5  ;;  %v2415_v30 = vld [vmem:[#allocation5 + $0xe4] ss:$8 sps:$4 sm:$0xff]   ;;  %v2417_v31 = vld [vmem:[#allocation5 + $0xe0] ss:$8 sps:$4 sm:$0xff]   ;;  %v2418_v32 = vld [vmem:[#allocation5 + $0xf4] ss:$8 sps:$4 sm:$0xff]  }
  0x55   :  { %893 = vmatprep.subr.bf16.mxu0 %v2382_v6  ;;  %v2420_v33 = vld [vmem:[#allocation5 + $0xf0] ss:$8 sps:$4 sm:$0xff]   ;;  %v2425_v34 = vld [vmem:[#allocation5 + $0x104] ss:$8 sps:$4 sm:$0xff]   ;;  %v2423_v37 = vld [vmem:[#allocation5 + $0x100] ss:$8 sps:$4 sm:$0xff]  }
  0x56   :  { %v2783_v35 = vld [vmem:[#allocation2 + $0x8] sm:$0xff]  ;;  %v2428_v39 = vld [vmem:[#allocation5 + $0x114] ss:$8 sps:$4 sm:$0xff]   ;;  %v2426_v40 = vld [vmem:[#allocation5 + $0x110] ss:$8 sps:$4 sm:$0xff]  }
  0x57   :  { %v2065_v38 = vcombine.high %v2783_v35, %v2783_v35  ;;  %v2431_v41 = vld [vmem:[#allocation5 + $0x124] ss:$8 sps:$4 sm:$0xff]   ;;  %v2429_v42 = vld [vmem:[#allocation5 + $0x120] ss:$8 sps:$4 sm:$0xff]   ;;  %v2434_v43 = vld [vmem:[#allocation5 + $0x134] ss:$8 sps:$4 sm:$0xff]  }
  0x58   :  { %894 = vmatpush1.bf16.msra.mxu0 %v2384_v7  ;;  %v2432_v44 = vld [vmem:[#allocation5 + $0x130] ss:$8 sps:$4 sm:$0xff]   ;;  %v2437_v45 = vld [vmem:[#allocation5 + $0x144] ss:$8 sps:$4 sm:$0xff]   ;;  %v2435_v46 = vld [vmem:[#allocation5 + $0x140] ss:$8 sps:$4 sm:$0xff]   ;;  %v2064_v7 = vcombine.low %v2783_v35, %v2783_v35 }
  0x59   :  { %895 = vmatprep.subr.bf16.mxu0 %v2385_v8  ;;  %v2440_v47 = vld [vmem:[#allocation5 + $0x154] ss:$8 sps:$4 sm:$0xff]   ;;  %v2438_v48 = vld [vmem:[#allocation5 + $0x150] ss:$8 sps:$4 sm:$0xff]   ;;  %v2443_v49 = vld [vmem:[#allocation5 + $0x164] ss:$8 sps:$4 sm:$0xff]  }
  0x5a   :  { %v2441_v50 = vld [vmem:[#allocation5 + $0x160] ss:$8 sps:$4 sm:$0xff]   ;;  %v2446_v51 = vld [vmem:[#allocation5 + $0x174] ss:$8 sps:$4 sm:$0xff]   ;;  %v2444_v52 = vld [vmem:[#allocation5 + $0x170] ss:$8 sps:$4 sm:$0xff]  }
  0x5b   :  { %v2449_v53 = vld [vmem:[#allocation5 + $0x184] ss:$8 sps:$4 sm:$0xff]   ;;  %v2447_v54 = vld [vmem:[#allocation5 + $0x180] ss:$8 sps:$4 sm:$0xff]   ;;  %v2452_v55 = vld [vmem:[#allocation5 + $0x194] ss:$8 sps:$4 sm:$0xff]  }
  0x5c   :  { %896 = vmatpush1.bf16.msra.mxu0 %v2387_v9  ;;  %v2450_v56 = vld [vmem:[#allocation5 + $0x190] ss:$8 sps:$4 sm:$0xff]   ;;  %v2455_v57 = vld [vmem:[#allocation5 + $0x1a4] ss:$8 sps:$4 sm:$0xff]   ;;  %v2453_v58 = vld [vmem:[#allocation5 + $0x1a0] ss:$8 sps:$4 sm:$0xff]  }
  0x5d   :  { %897 = vmatprep.subr.bf16.mxu0 %v2388_v10  ;;  %v2458_v59 = vld [vmem:[#allocation5 + $0x1b4] ss:$8 sps:$4 sm:$0xff]   ;;  %v2456_v60 = vld [vmem:[#allocation5 + $0x1b0] ss:$8 sps:$4 sm:$0xff]   ;;  %v2461_v61 = vld [vmem:[#allocation5 + $0x1c4] ss:$8 sps:$4 sm:$0xff]  }
  0x5e   :  { %v2459_v62 = vld [vmem:[#allocation5 + $0x1c0] ss:$8 sps:$4 sm:$0xff]   ;;  %v2464_v63 = vld [vmem:[#allocation5 + $0x1d4] ss:$8 sps:$4 sm:$0xff]   ;;  %v2462_v0 = vld [vmem:[#allocation5 + $0x1d0] ss:$8 sps:$4 sm:$0xff]  }
  0x5f   :  { %v2467_v1 = vld [vmem:[#allocation5 + $0x1e4] ss:$8 sps:$4 sm:$0xff]   ;;  %v2465_v2 = vld [vmem:[#allocation5 + $0x1e0] ss:$8 sps:$4 sm:$0xff]   ;;  %v2470_v3 = vld [vmem:[#allocation5 + $0x1f4] ss:$8 sps:$4 sm:$0xff]  }
  0x60   :  { %898 = vmatpush1.bf16.msra.mxu0 %v2390_v11  ;;  %v2468_v4 = vld [vmem:[#allocation5 + $0x1f0] ss:$8 sps:$4 sm:$0xff]   ;;  %v2475_v5 = vld [vmem:[#allocation5 + $0x204] ss:$8 sps:$4 sm:$0xff]   ;;  %v2473_v8 = vld [vmem:[#allocation5 + $0x200] ss:$8 sps:$4 sm:$0xff]  }
  0x61   :  { %899 = vmatprep.subr.bf16.mxu0 %v2391_v12  ;;  %v2787_v6 = vld [vmem:[#allocation2 + $0x10] sm:$0xff]  ;;  %v1063_v11 = vld [vmem:[#allocation7] sm:$0xff] }
  0x62   :  { %v2067_v9 = vcombine.high %v2787_v6, %v2787_v6  ;;  %v2478_v10 = vld [vmem:[#allocation5 + $0x214] ss:$8 sps:$4 sm:$0xff]   ;;  %v1067_v12 = vld [vmem:[#allocation7 + $0x20] sm:$0xff]  ;;  %v2476_v14 = vld [vmem:[#allocation5 + $0x210] ss:$8 sps:$4 sm:$0xff]  }
  0x63   :  { %v1071_v13 = vld [vmem:[#allocation7 + $0x40] sm:$0xff] }
  0x64   :  { %900 = vmatpush1.bf16.msra.mxu0 %v2393_v15  ;;  %v2199_v15 = vcombine.high %v1063_v11, %v1067_v12  ;;  %v2485_v35 = vld [vmem:[#allocation5 + $0x240] ss:$8 sps:$4 sm:$0xff]  }
  0x65   :  { %901 = vmatprep.subr.bf16.mxu0 %v2394_v16  ;;  %v2198_v16 = vcombine.low %v1063_v11, %v1067_v12  ;;  %v1151_v11 = vld [vmem:[#allocation7 + $0x2c0] sm:$0xff] }
  0x66   :  { %1873 = vmatprep.subr.bf16.mxu1 %v2199_v15  ;;  %v1155_v12 = vld [vmem:[#allocation7 + $0x2e0] sm:$0xff] }
  0x67   :  { %1874 = vmatpush1.bf16.msra.mxu1 %v2198_v16  ;;  %v2287_v15 = vcombine.high %v1151_v11, %v1155_v12  ;;  %v2511_v16 = vld [vmem:[#allocation5 + $0x2c4] ss:$8 sps:$4 sm:$0xff]  }
  0x68   :  { %902 = vmatpush1.bf16.msra.mxu0 %v2396_v17  ;;  %v1075_v17 = vld [vmem:[#allocation7 + $0x60] sm:$0xff] }
  0x69   :  { %903 = vmatprep.subr.bf16.mxu0 %v2397_v18  ;;  %v2481_v18 = vld [vmem:[#allocation5 + $0x224] ss:$8 sps:$4 sm:$0xff]  }
  0x6c   :  { %904 = vmatpush1.bf16.msra.mxu0 %v2399_v19  ;;  %v2207_v19 = vcombine.high %v1071_v13, %v1075_v17 }
  0x6d   :  { %905 = vmatprep.subr.bf16.mxu0 %v2400_v20  ;;  %v1079_v20 = vld [vmem:[#allocation7 + $0x80] sm:$0xff] }
  0x6e   :  { %1875 = vmatprep.subr.bf16.mxu1 %v2207_v19  ;;  %v2286_v19 = vcombine.low %v1151_v11, %v1155_v12 }
  0x70   :  { %906 = vmatpush1.bf16.msra.mxu0 %v2402_v21  ;;  %v1083_v21 = vld [vmem:[#allocation7 + $0xa0] sm:$0xff] }
  0x71   :  { %907 = vmatprep.subr.bf16.mxu0 %v2403_v22  ;;  %v2206_v22 = vcombine.low %v1071_v13, %v1075_v17  ;;  %v1159_v17 = vld [vmem:[#allocation7 + $0x300] sm:$0xff] }
  0x73   :  { %1876 = vmatpush1.bf16.msra.mxu1 %v2206_v22  ;;  %v2514_v22 = vld [vmem:[#allocation5 + $0x2d4] ss:$8 sps:$4 sm:$0xff]  }
  0x74   :  { %908 = vmatpush1.bf16.msra.mxu0 %v2405_v23  ;;  %v2479_v23 = vld [vmem:[#allocation5 + $0x220] ss:$8 sps:$4 sm:$0xff]  }
  0x75   :  { %909 = vmatprep.subr.bf16.mxu0 %v2406_v24  ;;  %v2215_v24 = vcombine.high %v1079_v20, %v1083_v21 }
  0x77   :  { %1877 = vmatprep.subr.bf16.mxu1 %v2215_v24  ;;  %v1171_v24 = vld [vmem:[#allocation7 + $0x360] sm:$0xff] }
  0x78   :  { %910 = vmatpush1.bf16.msra.mxu0 %v2408_v25  ;;  %v2484_v25 = vld [vmem:[#allocation5 + $0x234] ss:$8 sps:$4 sm:$0xff]  }
  0x79   :  { %911 = vmatprep.subr.bf16.mxu0 %v2409_v26  ;;  %v1087_v26 = vld [vmem:[#allocation7 + $0xc0] sm:$0xff] }
  0x7c   :  { %912 = vmatpush1.bf16.msra.mxu0 %v2411_v27  ;;  %v1091_v27 = vld [vmem:[#allocation7 + $0xe0] sm:$0xff] }
  0x7d   :  { %913 = vmatprep.subr.bf16.mxu0 %v2412_v28  ;;  %v2214_v28 = vcombine.low %v1079_v20, %v1083_v21  ;;  %v2509_v20 = vld [vmem:[#allocation5 + $0x2c0] ss:$8 sps:$4 sm:$0xff]  }
  0x7f   :  { %1878 = vmatpush1.bf16.msra.mxu1 %v2214_v28  ;;  %v2517_v28 = vld [vmem:[#allocation5 + $0x2e4] ss:$8 sps:$4 sm:$0xff]  }
  0x80   :  { %914 = vmatpush1.bf16.msra.mxu0 %v2414_v29  ;;  %v2482_v29 = vld [vmem:[#allocation5 + $0x230] ss:$8 sps:$4 sm:$0xff]  }
  0x81   :  { %915 = vmatprep.subr.bf16.mxu0 %v2415_v30  ;;  %v2223_v30 = vcombine.high %v1087_v26, %v1091_v27 }
  0x83   :  { %1879 = vmatprep.subr.bf16.mxu1 %v2223_v30  ;;  %v2515_v30 = vld [vmem:[#allocation5 + $0x2e0] ss:$8 sps:$4 sm:$0xff]  }
  0x84   :  { %916 = vmatpush1.bf16.msra.mxu0 %v2417_v31  ;;  %v2487_v31 = vld [vmem:[#allocation5 + $0x244] ss:$8 sps:$4 sm:$0xff]  }
  0x85   :  { %917 = vmatprep.subr.bf16.mxu0 %v2418_v32  ;;  %v1095_v32 = vld [vmem:[#allocation7 + $0x100] sm:$0xff] }
  0x88   :  { %918 = vmatpush1.bf16.msra.mxu0 %v2420_v33  ;;  %v1099_v33 = vld [vmem:[#allocation7 + $0x120] sm:$0xff] }
  0x89   :  { %928 = vmatprep.subr.bf16.mxu0 %v2425_v34  ;;  %v2222_v34 = vcombine.low %v1087_v26, %v1091_v27  ;;  %v2512_v26 = vld [vmem:[#allocation5 + $0x2d0] ss:$8 sps:$4 sm:$0xff]  }
  0x8b   :  { %920 = vmatmul.mubr.bf16.vlgmr.msra.gmra.mrb[0].mxu0 %v2062_v36  ;;  %v2231_v36 = vcombine.high %v1095_v32, %v1099_v33  ;;  %1880 = vmatpush1.bf16.msra.mxu1 %v2222_v34  ;;  %v2793_v34 = vld [vmem:[#allocation2 + $0x18] sm:$0xff] }
  0x8c   :  { %929 = vmatpush1.bf16.msra.mxu0 %v2423_v37  ;;  %960 = vmatprep.mubr.bf16.mxu0 %v2065_v38  ;;  %v2490_v37 = vld [vmem:[#allocation5 + $0x254] ss:$8 sps:$4 sm:$0xff]   ;;  %v1103_v38 = vld [vmem:[#allocation7 + $0x140] sm:$0xff] }
  0x8d   :  { %930 = vmatprep.subr.bf16.mxu0 %v2428_v39  ;;  %v1107_v39 = vld [vmem:[#allocation7 + $0x160] sm:$0xff]  ;;  %1881 = vmatprep.subr.bf16.mxu1 %v2231_v36 }
  0x8e   :  { %v2523_v36 = vld [vmem:[#allocation5 + $0x300] ss:$8 sps:$4 sm:$0xff]  }
  0x90   :  { %931 = vmatpush1.bf16.msra.mxu0 %v2426_v40  ;;  %v2230_v40 = vcombine.low %v1095_v32, %v1099_v33  ;;  %v2518_v32 = vld [vmem:[#allocation5 + $0x2f0] ss:$8 sps:$4 sm:$0xff]   ;;  %v2525_v33 = vld [vmem:[#allocation5 + $0x304] ss:$8 sps:$4 sm:$0xff]  }
  0x91   :  { %932 = vmatprep.subr.bf16.mxu0 %v2431_v41  ;;  %v2488_v41 = vld [vmem:[#allocation5 + $0x250] ss:$8 sps:$4 sm:$0xff]  }
  0x92   :  { %1882 = vmatpush1.bf16.msra.mxu1 %v2230_v40  ;;  %v2531_v40 = vld [vmem:[#allocation5 + $0x324] ss:$8 sps:$4 sm:$0xff]  }
  0x94   :  { %933 = vmatpush1.bf16.msra.mxu0 %v2429_v42  ;;  %v2239_v42 = vcombine.high %v1103_v38, %v1107_v39 }
  0x95   :  { %934 = vmatprep.subr.bf16.mxu0 %v2434_v43  ;;  %v2493_v43 = vld [vmem:[#allocation5 + $0x264] ss:$8 sps:$4 sm:$0xff]  }
  0x96   :  { %1883 = vmatprep.subr.bf16.mxu1 %v2239_v42  ;;  %v2534_v42 = vld [vmem:[#allocation5 + $0x334] ss:$8 sps:$4 sm:$0xff]  }
  0x98   :  { %935 = vmatpush1.bf16.msra.mxu0 %v2432_v44  ;;  %v1111_v44 = vld [vmem:[#allocation7 + $0x180] sm:$0xff] }
  0x99   :  { %936 = vmatprep.subr.bf16.mxu0 %v2437_v45  ;;  %v1115_v45 = vld [vmem:[#allocation7 + $0x1a0] sm:$0xff] }
  0x9c   :  { %937 = vmatpush1.bf16.msra.mxu0 %v2435_v46  ;;  %v2238_v46 = vcombine.low %v1103_v38, %v1107_v39  ;;  %v2528_v38 = vld [vmem:[#allocation5 + $0x314] ss:$8 sps:$4 sm:$0xff]   ;;  %v2526_v39 = vld [vmem:[#allocation5 + $0x310] ss:$8 sps:$4 sm:$0xff]  }
  0x9d   :  { %938 = vmatprep.subr.bf16.mxu0 %v2440_v47  ;;  %v2491_v47 = vld [vmem:[#allocation5 + $0x260] ss:$8 sps:$4 sm:$0xff]  }
  0x9e   :  { %1884 = vmatpush1.bf16.msra.mxu1 %v2238_v46  ;;  %v2538_v46 = vld [vmem:[#allocation5 + $0x350] ss:$8 sps:$4 sm:$0xff]  }
  0xa0   :  { %939 = vmatpush1.bf16.msra.mxu0 %v2438_v48  ;;  %v2247_v48 = vcombine.high %v1111_v44, %v1115_v45 }
  0xa1   :  { %940 = vmatprep.subr.bf16.mxu0 %v2443_v49  ;;  %v2496_v49 = vld [vmem:[#allocation5 + $0x274] ss:$8 sps:$4 sm:$0xff]  }
  0xa2   :  { %1885 = vmatprep.subr.bf16.mxu1 %v2247_v48  ;;  %v2541_v48 = vld [vmem:[#allocation5 + $0x360] ss:$8 sps:$4 sm:$0xff]  }
  0xa4   :  { %941 = vmatpush1.bf16.msra.mxu0 %v2441_v50  ;;  %v1119_v50 = vld [vmem:[#allocation7 + $0x1c0] sm:$0xff] }
  0xa5   :  { %942 = vmatprep.subr.bf16.mxu0 %v2446_v51  ;;  %v1123_v51 = vld [vmem:[#allocation7 + $0x1e0] sm:$0xff] }
  0xa8   :  { %943 = vmatpush1.bf16.msra.mxu0 %v2444_v52  ;;  %v2246_v52 = vcombine.low %v1111_v44, %v1115_v45  ;;  %v2535_v44 = vld [vmem:[#allocation5 + $0x340] ss:$8 sps:$4 sm:$0xff]   ;;  %v2540_v45 = vld [vmem:[#allocation5 + $0x354] ss:$8 sps:$4 sm:$0xff]  }
  0xa9   :  { %944 = vmatprep.subr.bf16.mxu0 %v2449_v53  ;;  %v2494_v53 = vld [vmem:[#allocation5 + $0x270] ss:$8 sps:$4 sm:$0xff]  }
  0xaa   :  { %1886 = vmatpush1.bf16.msra.mxu1 %v2246_v52  ;;  %v2547_v52 = vld [vmem:[#allocation5 + $0x380] ss:$8 sps:$4 sm:$0xff]  }
  0xac   :  { %945 = vmatpush1.bf16.msra.mxu0 %v2447_v54  ;;  %v2255_v54 = vcombine.high %v1119_v50, %v1123_v51 }
  0xad   :  { %946 = vmatprep.subr.bf16.mxu0 %v2452_v55  ;;  %v2499_v55 = vld [vmem:[#allocation5 + $0x284] ss:$8 sps:$4 sm:$0xff]  }
  0xae   :  { %1887 = vmatprep.subr.bf16.mxu1 %v2255_v54  ;;  %v2550_v54 = vld [vmem:[#allocation5 + $0x390] ss:$8 sps:$4 sm:$0xff]  }
  0xb0   :  { %947 = vmatpush1.bf16.msra.mxu0 %v2450_v56  ;;  %v1127_v56 = vld [vmem:[#allocation7 + $0x200] sm:$0xff] }
  0xb1   :  { %948 = vmatprep.subr.bf16.mxu0 %v2455_v57  ;;  %v1131_v57 = vld [vmem:[#allocation7 + $0x220] sm:$0xff] }
  0xb4   :  { %949 = vmatpush1.bf16.msra.mxu0 %v2453_v58  ;;  %v2254_v58 = vcombine.low %v1119_v50, %v1123_v51  ;;  %v2544_v50 = vld [vmem:[#allocation5 + $0x370] ss:$8 sps:$4 sm:$0xff]   ;;  %v2549_v51 = vld [vmem:[#allocation5 + $0x384] ss:$8 sps:$4 sm:$0xff]  }
  0xb5   :  { %950 = vmatprep.subr.bf16.mxu0 %v2458_v59  ;;  %v2497_v59 = vld [vmem:[#allocation5 + $0x280] ss:$8 sps:$4 sm:$0xff]  }
  0xb6   :  { %1888 = vmatpush1.bf16.msra.mxu1 %v2254_v58  ;;  %v2556_v58 = vld [vmem:[#allocation5 + $0x3b0] ss:$8 sps:$4 sm:$0xff]  }
  0xb8   :  { %951 = vmatpush1.bf16.msra.mxu0 %v2456_v60  ;;  %v2263_v60 = vcombine.high %v1127_v56, %v1131_v57 }
  0xb9   :  { %952 = vmatprep.subr.bf16.mxu0 %v2461_v61  ;;  %v2502_v61 = vld [vmem:[#allocation5 + $0x294] ss:$8 sps:$4 sm:$0xff]  }
  0xba   :  { %1889 = vmatprep.subr.bf16.mxu1 %v2263_v60  ;;  %v2559_v60 = vld [vmem:[#allocation5 + $0x3c0] ss:$8 sps:$4 sm:$0xff]  }
  0xbc   :  { %953 = vmatpush1.bf16.msra.mxu0 %v2459_v62  ;;  %v1135_v62 = vld [vmem:[#allocation7 + $0x240] sm:$0xff] }
  0xbd   :  { %954 = vmatprep.subr.bf16.mxu0 %v2464_v63  ;;  %v1139_v63 = vld [vmem:[#allocation7 + $0x260] sm:$0xff] }
  0xc0   :  { %955 = vmatpush1.bf16.msra.mxu0 %v2462_v0  ;;  %v2262_v0 = vcombine.low %v1127_v56, %v1131_v57  ;;  %v2553_v56 = vld [vmem:[#allocation5 + $0x3a0] ss:$8 sps:$4 sm:$0xff]   ;;  %v2558_v57 = vld [vmem:[#allocation5 + $0x3b4] ss:$8 sps:$4 sm:$0xff]  }
  0xc1   :  { %956 = vmatprep.subr.bf16.mxu0 %v2467_v1  ;;  %v2500_v1 = vld [vmem:[#allocation5 + $0x290] ss:$8 sps:$4 sm:$0xff]  }
  0xc2   :  { %1890 = vmatpush1.bf16.msra.mxu1 %v2262_v0  ;;  %v2565_v0 = vld [vmem:[#allocation5 + $0x3e0] ss:$8 sps:$4 sm:$0xff]  }
  0xc4   :  { %957 = vmatpush1.bf16.msra.mxu0 %v2465_v2  ;;  %v2271_v2 = vcombine.high %v1135_v62, %v1139_v63 }
  0xc5   :  { %958 = vmatprep.subr.bf16.mxu0 %v2470_v3  ;;  %v2505_v3 = vld [vmem:[#allocation5 + $0x2a4] ss:$8 sps:$4 sm:$0xff]  }
  0xc6   :  { %1891 = vmatprep.subr.bf16.mxu1 %v2271_v2  ;;  %v2568_v2 = vld [vmem:[#allocation5 + $0x3f0] ss:$8 sps:$4 sm:$0xff]  }
  0xc8   :  { %959 = vmatpush1.bf16.msra.mxu0 %v2468_v4  ;;  %v1143_v4 = vld [vmem:[#allocation7 + $0x280] sm:$0xff] }
  0xc9   :  { %969 = vmatprep.subr.bf16.mxu0 %v2475_v5  ;;  %v1147_v5 = vld [vmem:[#allocation7 + $0x2a0] sm:$0xff] }
  0xca   :  { %v2278_v13 = vcombine.low %v1143_v4, %v1147_v5 }
  0xcb   :  { %961 = vmatmul.mubr.bf16.vlgmr.msra.gmra.mrb[0].mxu0 %v2064_v7  ;;  %v2270_v7 = vcombine.low %v1135_v62, %v1139_v63  ;;  %v2562_v62 = vld [vmem:[#allocation5 + $0x3d0] ss:$8 sps:$4 sm:$0xff]   ;;  %v2567_v63 = vld [vmem:[#allocation5 + $0x3e4] ss:$8 sps:$4 sm:$0xff]  }
  0xcc   :  { %970 = vmatpush1.bf16.msra.mxu0 %v2473_v8  ;;  %1001 = vmatprep.mubr.bf16.mxu0 %v2067_v9  ;;  %v2503_v8 = vld [vmem:[#allocation5 + $0x2a0] ss:$8 sps:$4 sm:$0xff]   ;;  %v2279_v9 = vcombine.high %v1143_v4, %v1147_v5 }
  0xcd   :  { %971 = vmatprep.subr.bf16.mxu0 %v2478_v10  ;;  %v2508_v10 = vld [vmem:[#allocation5 + $0x2b4] ss:$8 sps:$4 sm:$0xff]   ;;  %1892 = vmatpush1.bf16.msra.mxu1 %v2270_v7  ;;  %v1175_v4 = vld [vmem:[#allocation7 + $0x380] sm:$0xff] }
  0xce   :  { %1893 = vmatprep.subr.bf16.mxu1 %v2279_v9  ;;  %v1179_v5 = vld [vmem:[#allocation7 + $0x3a0] sm:$0xff] }
  0xcf   :  { %v2311_v7 = vcombine.high %v1175_v4, %v1179_v5  ;;  %v1183_v9 = vld [vmem:[#allocation7 + $0x3c0] sm:$0xff] }
  0xd0   :  { %972 = vmatpush1.bf16.msra.mxu0 %v2476_v14  ;;  %v2506_v14 = vld [vmem:[#allocation5 + $0x2b0] ss:$8 sps:$4 sm:$0xff]  }
  0xd1   :  { %973 = vmatprep.subr.bf16.mxu0 %v2481_v18  ;;  %v1163_v18 = vld [vmem:[#allocation7 + $0x320] sm:$0xff]  ;;  %1894 = vmatpush1.bf16.msra.mxu1 %v2278_v13  ;;  %v1064_v13 = vld [vmem:[#allocation7 + $0x8] sm:$0xff] }
  0xd2   :  { %1895 = vmatprep.subr.bf16.mxu1 %v2287_v15  ;;  %v2295_v21 = vcombine.high %v1159_v17, %v1163_v18 }
  0xd4   :  { %974 = vmatpush1.bf16.msra.mxu0 %v2479_v23  ;;  %v1167_v23 = vld [vmem:[#allocation7 + $0x340] sm:$0xff] }
  0xd5   :  { %975 = vmatprep.subr.bf16.mxu0 %v2484_v25  ;;  %1896 = vmatpush1.bf16.msra.mxu1 %v2286_v19  ;;  %v2294_v25 = vcombine.low %v1159_v17, %v1163_v18  ;;  %v2303_v27 = vcombine.high %v1167_v23, %v1171_v24  ;;  %v209_v17 = vlaneseq }
  0xd6   :  { %1897 = vmatprep.subr.bf16.mxu1 %v2295_v21 }
  0xd7   :  { %v2801_v18 = vshrl.u32 %v209_v17, 7 }
  0xd8   :  { %976 = vmatpush1.bf16.msra.mxu0 %v2482_v29  ;;  %v2302_v29 = vcombine.low %v1167_v23, %v1171_v24 }
  0xd9   :  { %977 = vmatprep.subr.bf16.mxu0 %v2487_v31  ;;  %1898 = vmatpush1.bf16.msra.mxu1 %v2294_v25  ;;  %v2520_v31 = vld [vmem:[#allocation5 + $0x2f4] ss:$8 sps:$4 sm:$0xff]   ;;  %v211_v19 = vsub.s32 0, %v2801_v18  ;;  %v215_v21 = vsub.s32 1, %v2801_v18 }
  0xda   :  { %1899 = vmatprep.subr.bf16.mxu1 %v2303_v27  ;;  %v1054_v27 = vld [vmem:[%s2881_s5 + $0x8] sm:$0xff] }
  0xdb   :  { %vm1056_vm0 = vcmp.lt.s32.totalorder %v1054_v27, 4194304  ;;  %v1172_v27 = vld [vmem:[#allocation7 + $0x368] sm:$0xff] }
  0xdc   :  { %978 = vmatpush1.bf16.msra.mxu0 %v2485_v35  ;;  %v2066_v35 = vcombine.low %v2787_v6, %v2787_v6  ;;  %v2537_v6 = vld [vmem:[#allocation5 + $0x344] ss:$8 sps:$4 sm:$0xff]   ;;  %vm2818_vm2 = vmpackc.low %vm1056_vm0, %vm1056_vm0 }
  0xdd   :  { %979 = vmatprep.subr.bf16.mxu0 %v2490_v37  ;;  %1900 = vmatpush1.bf16.msra.mxu1 %v2302_v29  ;;  %v2069_v37 = vcombine.high %v2793_v34, %v2793_v34 }
  0xde   :  { %1901 = vmatprep.subr.bf16.mxu1 %v2311_v7  ;;  %v1136_v7 = vld [vmem:[#allocation7 + $0x248] sm:$0xff] }
  0xe0   :  { %980 = vmatpush1.bf16.msra.mxu0 %v2488_v41  ;;  %v2529_v41 = vld [vmem:[#allocation5 + $0x320] ss:$8 sps:$4 sm:$0xff]  }
  0xe1   :  { %981 = vmatprep.subr.bf16.mxu0 %v2493_v43  ;;  %v2532_v43 = vld [vmem:[#allocation5 + $0x330] ss:$8 sps:$4 sm:$0xff]  }
  0xe4   :  { %982 = vmatpush1.bf16.msra.mxu0 %v2491_v47  ;;  %v2543_v47 = vld [vmem:[#allocation5 + $0x364] ss:$8 sps:$4 sm:$0xff]  }
  0xe5   :  { %983 = vmatprep.subr.bf16.mxu0 %v2496_v49  ;;  %v2546_v49 = vld [vmem:[#allocation5 + $0x374] ss:$8 sps:$4 sm:$0xff]  }
  0xe8   :  { %984 = vmatpush1.bf16.msra.mxu0 %v2494_v53  ;;  %v2552_v53 = vld [vmem:[#allocation5 + $0x394] ss:$8 sps:$4 sm:$0xff]  }
  0xe9   :  { %985 = vmatprep.subr.bf16.mxu0 %v2499_v55  ;;  %v2555_v55 = vld [vmem:[#allocation5 + $0x3a4] ss:$8 sps:$4 sm:$0xff]  }
  0xec   :  { %986 = vmatpush1.bf16.msra.mxu0 %v2497_v59  ;;  %v2561_v59 = vld [vmem:[#allocation5 + $0x3c4] ss:$8 sps:$4 sm:$0xff]  }
  0xed   :  { %987 = vmatprep.subr.bf16.mxu0 %v2502_v61  ;;  %v2564_v61 = vld [vmem:[#allocation5 + $0x3d4] ss:$8 sps:$4 sm:$0xff]  }
  0xf0   :  { %988 = vmatpush1.bf16.msra.mxu0 %v2500_v1  ;;  %v2570_v1 = vld [vmem:[#allocation5 + $0x3f4] ss:$8 sps:$4 sm:$0xff]  }
  0xf1   :  { %989 = vmatprep.subr.bf16.mxu0 %v2505_v3  ;;  %v2068_v3 = vcombine.low %v2793_v34, %v2793_v34 }
  0xf4   :  { %990 = vmatpush1.bf16.msra.mxu0 %v2503_v8  ;;  %v2310_v8 = vcombine.low %v1175_v4, %v1179_v5 }
  0xf5   :  { %991 = vmatprep.subr.bf16.mxu0 %v2508_v10  ;;  %v1187_v10 = vld [vmem:[#allocation7 + $0x3e0] sm:$0xff] }
  0xf6   :  { %1902 = vmatpush1.bf16.msra.mxu1 %v2310_v8  ;;  %v2319_v11 = vcombine.high %v1183_v9, %v1187_v10  ;;  %v2318_v12 = vcombine.low %v1183_v9, %v1187_v10  ;;  %v1140_v8 = vld [vmem:[#allocation7 + $0x268] sm:$0xff] }
  0xf7   :  { %v2273_v10 = vcombine.high %v1136_v7, %v1140_v8 }
  0xf8   :  { %992 = vmatpush1.bf16.msra.mxu0 %v2506_v14  ;;  %1903 = vmatprep.subr.bf16.mxu1 %v2319_v11  ;;  %v1068_v14 = vld [vmem:[#allocation7 + $0x28] sm:$0xff] }
  0xf9   :  { %993 = vmatprep.subr.bf16.mxu0 %v2511_v16  ;;  %v2201_v15 = vcombine.high %v1064_v13, %v1068_v14  ;;  %v2200_v16 = vcombine.low %v1064_v13, %v1068_v14  ;;  %v1144_v11 = vld [vmem:[#allocation7 + $0x288] sm:$0xff]  ;;  %v2272_v13 = vcombine.low %v1136_v7, %v1140_v8  ;;  %v1125_v7 = vld [vmem:[#allocation7 + $0x1f0] sm:$0xff] }
  0xfa   :  { %1904 = vmatpush1.bf16.msra.mxu1 %v2318_v12  ;;  %v1148_v12 = vld [vmem:[#allocation7 + $0x2a8] sm:$0xff] }
  0xfb   :  { %1914 = vmatprep.subr.bf16.mxu1 %v2201_v15  ;;  %v2281_v14 = vcombine.high %v1144_v11, %v1148_v12  ;;  %v1152_v15 = vld [vmem:[#allocation7 + $0x2c8] sm:$0xff]  ;;  %v2280_v17 = vcombine.low %v1144_v11, %v1148_v12  ;;  %v1133_v11 = vld [vmem:[#allocation7 + $0x230] sm:$0xff] }
  0xfc   :  { %994 = vmatpush1.bf16.msra.mxu0 %v2509_v20  ;;  %v207_v20 = vld [vmem:[%s2878_s2] sm:$0x3]  ;;  %s2699_s2 = smov [#allocation10]  }
  0xfd   :  { %995 = vmatprep.subr.bf16.mxu0 %v2514_v22  ;;  %v212_v22 = vrot.slane %v207_v20, %v211_v19  ;;  %v216_v23 = vrot.slane %v207_v20, %v215_v21 }
 0x100   :  { %996 = vmatpush1.bf16.msra.mxu0 %v2512_v26 }
 0x101   :  { %997 = vmatprep.subr.bf16.mxu0 %v2517_v28 }
 0x104   :  { %998 = vmatpush1.bf16.msra.mxu0 %v2515_v30  ;;  %v1053_v30 = vld [vmem:[%s2881_s5] sm:$0xff]  ;;  %s2051_s5 = sshll.u32 %s2699_s2, 4  ;;  %s2052_s5 = int_to_ptr.vmem [resolvable:$true] %s2051_s5 }
 0x105   :  { %999 = vmatprep.subr.bf16.mxu0 %v2520_v31  ;;  %vm1055_vm1 = vcmp.lt.s32.totalorder %v1053_v30, 4194304  ;;  %v1176_v30 = vld [vmem:[#allocation7 + $0x388] sm:$0xff]  ;;  %s2661_s26 = scalar_lea.vmem %s2052_s5, 1024  ;;  %p2666_p5 = scmp.lt.s32.totalorder %s2052_s5, %s2052_s5 }
 0x106   :  { %vm2824_vm3 = vmpackc.low %vm1055_vm1, %vm1055_vm1  ;;  %p2662_p4 = scmp.ne.s32.totalorder %s2052_s5, %s2661_s26  ;;  %p2667_p6 = scmp.lt.s32.totalorder %s2661_s26, %s2661_s26 }
 0x108   :  { %1000 = vmatpush1.bf16.msra.mxu0 %v2518_v32  ;;  %p2668_p7 = por %p2667_p6, %p2666_p5 }
 0x109   :  { %1010 = vmatprep.subr.bf16.mxu0 %v2525_v33 }
 0x10a   :  { %p2669_p8 = pnand %p2668_p7, %p2662_p4 }
 0x10b   :  { %1002 = vmatmul.mubr.bf16.vlgmr.msra.gmra.mrb[0].mxu0 %v2066_v35 }
 0x10c   :  { %1011 = vmatpush1.bf16.msra.mxu0 %v2523_v36  ;;  %1042 = vmatprep.mubr.bf16.mxu0 %v2069_v37  ;;  %v1072_v36 = vld [vmem:[#allocation7 + $0x48] sm:$0xff] }
 0x10d   :  { %1012 = vmatprep.subr.bf16.mxu0 %v2528_v38  ;;  %v1076_v37 = vld [vmem:[#allocation7 + $0x68] sm:$0xff] }
 0x110   :  { %1013 = vmatpush1.bf16.msra.mxu0 %v2526_v39 }
 0x111   :  { %1014 = vmatprep.subr.bf16.mxu0 %v2531_v40  ;;  %v1207_v40 = vsub.s32 3, %v2801_v18 }
 0x114   :  { %1015 = vmatpush1.bf16.msra.mxu0 %v2529_v41 }
 0x115   :  { %1016 = vmatprep.subr.bf16.mxu0 %v2534_v42  ;;  %v2209_v42 = vcombine.high %v1072_v36, %v1076_v37 }
 0x118   :  { %1017 = vmatpush1.bf16.msra.mxu0 %v2532_v43  ;;  %v1080_v43 = vld [vmem:[#allocation7 + $0x88] sm:$0xff] }
 0x119   :  { %1018 = vmatprep.subr.bf16.mxu0 %v2537_v6  ;;  %v1084_v6 = vld [vmem:[#allocation7 + $0xa8] sm:$0xff] }
 0x11c   :  { %1019 = vmatpush1.bf16.msra.mxu0 %v2535_v44  ;;  %v2208_v44 = vcombine.low %v1072_v36, %v1076_v37 }
 0x11d   :  { %1020 = vmatprep.subr.bf16.mxu0 %v2540_v45  ;;  %v2217_v45 = vcombine.high %v1080_v43, %v1084_v6 }
 0x120   :  { %1021 = vmatpush1.bf16.msra.mxu0 %v2538_v46  ;;  %v1088_v46 = vld [vmem:[#allocation7 + $0xc8] sm:$0xff] }
 0x121   :  { %1022 = vmatprep.subr.bf16.mxu0 %v2543_v47  ;;  %v1092_v47 = vld [vmem:[#allocation7 + $0xe8] sm:$0xff] }
 0x124   :  { %1023 = vmatpush1.bf16.msra.mxu0 %v2541_v48  ;;  %v2216_v48 = vcombine.low %v1080_v43, %v1084_v6  ;;  %v1069_v43 = vld [vmem:[#allocation7 + $0x30] sm:$0xff] }
 0x125   :  { %1024 = vmatprep.subr.bf16.mxu0 %v2546_v49  ;;  %v2225_v49 = vcombine.high %v1088_v46, %v1092_v47 }
 0x128   :  { %1025 = vmatpush1.bf16.msra.mxu0 %v2544_v50  ;;  %v1096_v50 = vld [vmem:[#allocation7 + $0x108] sm:$0xff] }
 0x129   :  { %1026 = vmatprep.subr.bf16.mxu0 %v2549_v51  ;;  %v1100_v51 = vld [vmem:[#allocation7 + $0x128] sm:$0xff] }
 0x12c   :  { %1027 = vmatpush1.bf16.msra.mxu0 %v2547_v52  ;;  %v2224_v52 = vcombine.low %v1088_v46, %v1092_v47  ;;  %v1077_v46 = vld [vmem:[#allocation7 + $0x70] sm:$0xff] }
 0x12d   :  { %1028 = vmatprep.subr.bf16.mxu0 %v2552_v53  ;;  %v2233_v53 = vcombine.high %v1096_v50, %v1100_v51 }
 0x130   :  { %1029 = vmatpush1.bf16.msra.mxu0 %v2550_v54  ;;  %v1104_v54 = vld [vmem:[#allocation7 + $0x148] sm:$0xff] }
 0x131   :  { %1030 = vmatprep.subr.bf16.mxu0 %v2555_v55  ;;  %v1108_v55 = vld [vmem:[#allocation7 + $0x168] sm:$0xff] }
 0x134   :  { %1031 = vmatpush1.bf16.msra.mxu0 %v2553_v56  ;;  %v2232_v56 = vcombine.low %v1096_v50, %v1100_v51  ;;  %v1085_v50 = vld [vmem:[#allocation7 + $0xb0] sm:$0xff] }
 0x135   :  { %1032 = vmatprep.subr.bf16.mxu0 %v2558_v57  ;;  %v2241_v57 = vcombine.high %v1104_v54, %v1108_v55 }
 0x138   :  { %1033 = vmatpush1.bf16.msra.mxu0 %v2556_v58  ;;  %v1112_v58 = vld [vmem:[#allocation7 + $0x188] sm:$0xff] }
 0x139   :  { %1034 = vmatprep.subr.bf16.mxu0 %v2561_v59  ;;  %v1116_v59 = vld [vmem:[#allocation7 + $0x1a8] sm:$0xff] }
 0x13c   :  { %1035 = vmatpush1.bf16.msra.mxu0 %v2559_v60  ;;  %v2240_v60 = vcombine.low %v1104_v54, %v1108_v55  ;;  %v1093_v54 = vld [vmem:[#allocation7 + $0xf0] sm:$0xff] }
 0x13d   :  { %1036 = vmatprep.subr.bf16.mxu0 %v2564_v61  ;;  %v2249_v61 = vcombine.high %v1112_v58, %v1116_v59 }
 0x140   :  { %1037 = vmatpush1.bf16.msra.mxu0 %v2562_v62  ;;  %v1120_v62 = vld [vmem:[#allocation7 + $0x1c8] sm:$0xff] }
 0x141   :  { %1038 = vmatprep.subr.bf16.mxu0 %v2567_v63  ;;  %v1124_v63 = vld [vmem:[#allocation7 + $0x1e8] sm:$0xff] }
 0x142   :  { %v2256_v4 = vcombine.low %v1120_v62, %v1124_v63 }
 0x144   :  { %1039 = vmatpush1.bf16.msra.mxu0 %v2565_v0  ;;  %v2248_v0 = vcombine.low %v1112_v58, %v1116_v59  ;;  %v1101_v58 = vld [vmem:[#allocation7 + $0x130] sm:$0xff] }
 0x145   :  { %1040 = vmatprep.subr.bf16.mxu0 %v2570_v1  ;;  %v2257_v1 = vcombine.high %v1120_v62, %v1124_v63  ;;  %v1109_v62 = vld [vmem:[#allocation7 + $0x170] sm:$0xff] }
 0x148   :  { %1041 = vmatpush1.bf16.msra.mxu0 %v2568_v2  ;;  %v1128_v2 = vld [vmem:[#allocation7 + $0x208] sm:$0xff] }
 0x14b   :  { %1043 = vmatmul.mubr.bf16.vlgmr.msra.gmra.mrb[0].mxu0 %v2068_v3  ;;  %v1132_v3 = vld [vmem:[#allocation7 + $0x228] sm:$0xff] }
 0x14c   :  { %v2265_v5 = vcombine.high %v1128_v2, %v1132_v3  ;;  %v2264_v9 = vcombine.low %v1128_v2, %v1132_v3  ;;  %v1117_v2 = vld [vmem:[#allocation7 + $0x1b0] sm:$0xff] }
 0x21e   :  { %v1044_v24 = vpop.f32.mrb[0].mxu0 }
 0x21f   :  { %v2350_v25 = vadd.f32 %v1044_v24, %v212_v22  ;;  %v1046_v26 = vpop.f32.mrb[1].mxu0  ;;  %v1160_v22 = vld [vmem:[#allocation7 + $0x308] sm:$0xff] }
 0x220   :  { %v2351_v28 = vadd.f32 %v1046_v26, %v216_v23  ;;  %v1048_v29 = vpop.f32.mrb[2].mxu0  ;;  %v1164_v23 = vld [vmem:[#allocation7 + $0x328] sm:$0xff] }
 0x221   :  { %v1051_v31 = vmax.f32 %v2350_v25, 0.0  ;;  %v1049_v32 = vpop.f32.mrb[3].mxu0  ;;  %v2297_v25 = vcombine.high %v1160_v22, %v1164_v23  ;;  %v1168_v26 = vld [vmem:[#allocation7 + $0x348] sm:$0xff] }
 0x222   :  { %v1052_v33 = vmax.f32 %v2351_v28, 0.0  ;;  %v2296_v28 = vcombine.low %v1160_v22, %v1164_v23  ;;  %v2305_v29 = vcombine.high %v1168_v26, %v1172_v27  ;;  %v2304_v32 = vcombine.low %v1168_v26, %v1172_v27  ;;  %v1149_v22 = vld [vmem:[#allocation7 + $0x2b0] sm:$0xff] }
 0x223   :  { %v1057_v34 = vmul.f32 4.0, %v1051_v31  ;;  %v1180_v31 = vld [vmem:[#allocation7 + $0x3a8] sm:$0xff]  ;;  %v1157_v26 = vld [vmem:[#allocation7 + $0x2f0] sm:$0xff] }
 0x224   :  { %v1058_v35 = vmul.f32 4.0, %v1052_v33  ;;  %v2313_v33 = vcombine.high %v1176_v30, %v1180_v31  ;;  %v2312_v36 = vcombine.low %v1176_v30, %v1180_v31  ;;  %v1165_v30 = vld [vmem:[#allocation7 + $0x330] sm:$0xff] }
 0x225   :  { %v2828_v41 = vpack.c.bf16 %v1057_v34, %v1057_v34  ;;  %v1184_v34 = vld [vmem:[#allocation7 + $0x3c8] sm:$0xff] }
 0x226   :  { %v2822_v39 = vpack.c.bf16 %v1058_v35, %v1058_v35  ;;  %v1188_v35 = vld [vmem:[#allocation7 + $0x3e8] sm:$0xff] }
 0x227   :  { %v2321_v37 = vcombine.high %v1184_v34, %v1188_v35  ;;  %v2320_v6 = vcombine.low %v1184_v34, %v1188_v35  ;;  %v1173_v34 = vld [vmem:[#allocation7 + $0x370] sm:$0xff] }
 0x228   :  { %2328 = vmatprep.mubr.msk.bf16.mxu1 %vm2818_vm2, %v2822_v39 }
 0x229   :  { %2331 = vmatmul.mubr.msk.bf16.vlgmr.msra.gmra.mrb[0].mxu1 %vm2824_vm3, %v2828_v41 }
 0x22a   :  { %1915 = vmatpush1.bf16.msra.mxu1 %v2200_v16  ;;  %2334 = vmatprep.mubr.msk.bf16.mxu1 %vm2818_vm2, %v2822_v39  ;;  %v1156_v16 = vld [vmem:[#allocation7 + $0x2e8] sm:$0xff] }
 0x22b   :  { %1916 = vmatprep.subr.bf16.mxu1 %v2209_v42  ;;  %v2289_v20 = vcombine.high %v1152_v15, %v1156_v16  ;;  %v2288_v24 = vcombine.low %v1152_v15, %v1156_v16  ;;  %v1065_v42 = vld [vmem:[#allocation7 + $0x10] sm:$0xff] }
 0x22c   :  { %v2202_v47 = vcombine.low %v1065_v42, %v1069_v43  ;;  %v1141_v15 = vld [vmem:[#allocation7 + $0x270] sm:$0xff] }
 0x22e   :  { %1917 = vmatpush1.bf16.msra.mxu1 %v2208_v44  ;;  %v2203_v44 = vcombine.high %v1065_v42, %v1069_v43  ;;  %v1181_v42 = vld [vmem:[#allocation7 + $0x3b0] sm:$0xff] }
 0x22f   :  { %1918 = vmatprep.subr.bf16.mxu1 %v2217_v45  ;;  %v1073_v45 = vld [vmem:[#allocation7 + $0x50] sm:$0xff] }
 0x230   :  { %v2210_v51 = vcombine.low %v1073_v45, %v1077_v46 }
 0x232   :  { %1919 = vmatpush1.bf16.msra.mxu1 %v2216_v48  ;;  %v2211_v48 = vcombine.high %v1073_v45, %v1077_v46  ;;  %v1189_v45 = vld [vmem:[#allocation7 + $0x3f0] sm:$0xff] }
 0x233   :  { %1920 = vmatprep.subr.bf16.mxu1 %v2225_v49  ;;  %v1081_v49 = vld [vmem:[#allocation7 + $0x90] sm:$0xff] }
 0x234   :  { %v2218_v55 = vcombine.low %v1081_v49, %v1085_v50 }
 0x236   :  { %1921 = vmatpush1.bf16.msra.mxu1 %v2224_v52  ;;  %v2219_v52 = vcombine.high %v1081_v49, %v1085_v50  ;;  %v1070_v49 = vld [vmem:[#allocation7 + $0x38] sm:$0xff] }
 0x237   :  { %1922 = vmatprep.subr.bf16.mxu1 %v2233_v53  ;;  %v1089_v53 = vld [vmem:[#allocation7 + $0xd0] sm:$0xff] }
 0x238   :  { %v2226_v59 = vcombine.low %v1089_v53, %v1093_v54 }
 0x23a   :  { %1923 = vmatpush1.bf16.msra.mxu1 %v2232_v56  ;;  %v2227_v56 = vcombine.high %v1089_v53, %v1093_v54  ;;  %v1078_v53 = vld [vmem:[#allocation7 + $0x78] sm:$0xff] }
 0x23b   :  { %1924 = vmatprep.subr.bf16.mxu1 %v2241_v57  ;;  %v1097_v57 = vld [vmem:[#allocation7 + $0x110] sm:$0xff] }
 0x23c   :  { %v2234_v63 = vcombine.low %v1097_v57, %v1101_v58 }
 0x23e   :  { %1925 = vmatpush1.bf16.msra.mxu1 %v2240_v60  ;;  %v2235_v60 = vcombine.high %v1097_v57, %v1101_v58  ;;  %v1086_v57 = vld [vmem:[#allocation7 + $0xb8] sm:$0xff] }
 0x23f   :  { %1926 = vmatprep.subr.bf16.mxu1 %v2249_v61  ;;  %v1105_v61 = vld [vmem:[#allocation7 + $0x150] sm:$0xff] }
 0x240   :  { %v2242_v3 = vcombine.low %v1105_v61, %v1109_v62 }
 0x242   :  { %1927 = vmatpush1.bf16.msra.mxu1 %v2248_v0  ;;  %v2243_v0 = vcombine.high %v1105_v61, %v1109_v62  ;;  %v1094_v61 = vld [vmem:[#allocation7 + $0xf8] sm:$0xff] }
 0x243   :  { %1928 = vmatprep.subr.bf16.mxu1 %v2257_v1  ;;  %v1113_v1 = vld [vmem:[#allocation7 + $0x190] sm:$0xff] }
 0x244   :  { %v2250_v8 = vcombine.low %v1113_v1, %v1117_v2 }
 0x246   :  { %1929 = vmatpush1.bf16.msra.mxu1 %v2256_v4  ;;  %v2251_v4 = vcombine.high %v1113_v1, %v1117_v2  ;;  %v1102_v1 = vld [vmem:[#allocation7 + $0x138] sm:$0xff] }
 0x247   :  { %1930 = vmatprep.subr.bf16.mxu1 %v2265_v5  ;;  %v1121_v5 = vld [vmem:[#allocation7 + $0x1d0] sm:$0xff] }
 0x248   :  { %v2258_v12 = vcombine.low %v1121_v5, %v1125_v7 }
 0x24a   :  { %1931 = vmatpush1.bf16.msra.mxu1 %v2264_v9  ;;  %v2259_v9 = vcombine.high %v1121_v5, %v1125_v7  ;;  %v1110_v5 = vld [vmem:[#allocation7 + $0x178] sm:$0xff] }
 0x24b   :  { %1932 = vmatprep.subr.bf16.mxu1 %v2273_v10  ;;  %v1129_v10 = vld [vmem:[#allocation7 + $0x210] sm:$0xff]  ;;  %v1114_v7 = vld [vmem:[#allocation7 + $0x198] sm:$0xff] }
 0x24c   :  { %v2266_v16 = vcombine.low %v1129_v10, %v1133_v11 }
 0x24e   :  { %1933 = vmatpush1.bf16.msra.mxu1 %v2272_v13  ;;  %v2267_v13 = vcombine.high %v1129_v10, %v1133_v11  ;;  %v1122_v11 = vld [vmem:[#allocation7 + $0x1d8] sm:$0xff] }
 0x24f   :  { %1934 = vmatprep.subr.bf16.mxu1 %v2281_v14  ;;  %v1137_v14 = vld [vmem:[#allocation7 + $0x250] sm:$0xff] }
 0x250   :  { %v2274_v23 = vcombine.low %v1137_v14, %v1141_v15 }
 0x252   :  { %1935 = vmatpush1.bf16.msra.mxu1 %v2280_v17  ;;  %v2275_v17 = vcombine.high %v1137_v14, %v1141_v15  ;;  %v1130_v15 = vld [vmem:[#allocation7 + $0x218] sm:$0xff] }
 0x253   :  { %1936 = vmatprep.subr.bf16.mxu1 %v2289_v20  ;;  %v1145_v20 = vld [vmem:[#allocation7 + $0x290] sm:$0xff] }
 0x254   :  { %v2282_v27 = vcombine.low %v1145_v20, %v1149_v22 }
 0x256   :  { %1937 = vmatpush1.bf16.msra.mxu1 %v2288_v24  ;;  %v2283_v24 = vcombine.high %v1145_v20, %v1149_v22  ;;  %v1138_v22 = vld [vmem:[#allocation7 + $0x258] sm:$0xff] }
 0x257   :  { %1938 = vmatprep.subr.bf16.mxu1 %v2297_v25  ;;  %v1153_v25 = vld [vmem:[#allocation7 + $0x2d0] sm:$0xff] }
 0x258   :  { %v2290_v31 = vcombine.low %v1153_v25, %v1157_v26 }
 0x25a   :  { %1939 = vmatpush1.bf16.msra.mxu1 %v2296_v28  ;;  %v2291_v28 = vcombine.high %v1153_v25, %v1157_v26  ;;  %v1146_v26 = vld [vmem:[#allocation7 + $0x298] sm:$0xff] }
 0x25b   :  { %1940 = vmatprep.subr.bf16.mxu1 %v2305_v29  ;;  %v1161_v29 = vld [vmem:[#allocation7 + $0x310] sm:$0xff] }
 0x25c   :  { %v2298_v35 = vcombine.low %v1161_v29, %v1165_v30 }
 0x25e   :  { %1941 = vmatpush1.bf16.msra.mxu1 %v2304_v32  ;;  %v2299_v32 = vcombine.high %v1161_v29, %v1165_v30  ;;  %v1154_v30 = vld [vmem:[#allocation7 + $0x2d8] sm:$0xff] }
 0x25f   :  { %1942 = vmatprep.subr.bf16.mxu1 %v2313_v33  ;;  %v1169_v33 = vld [vmem:[#allocation7 + $0x350] sm:$0xff] }
 0x260   :  { %v2306_v43 = vcombine.low %v1169_v33, %v1173_v34 }
 0x262   :  { %1943 = vmatpush1.bf16.msra.mxu1 %v2312_v36  ;;  %v2307_v36 = vcombine.high %v1169_v33, %v1173_v34  ;;  %v1162_v34 = vld [vmem:[#allocation7 + $0x318] sm:$0xff] }
 0x263   :  { %1944 = vmatprep.subr.bf16.mxu1 %v2321_v37  ;;  %v1177_v37 = vld [vmem:[#allocation7 + $0x390] sm:$0xff] }
 0x264   :  { %v2314_v46 = vcombine.low %v1177_v37, %v1181_v42 }
 0x266   :  { %1945 = vmatpush1.bf16.msra.mxu1 %v2320_v6  ;;  %v2315_v6 = vcombine.high %v1177_v37, %v1181_v42  ;;  %v1170_v42 = vld [vmem:[#allocation7 + $0x358] sm:$0xff] }
 0x267   :  { %1955 = vmatprep.subr.bf16.mxu1 %v2203_v44  ;;  %v1185_v44 = vld [vmem:[#allocation7 + $0x3d0] sm:$0xff] }
 0x268   :  { %v2322_v50 = vcombine.low %v1185_v44, %v1189_v45 }
 0x269   :  { %2337 = vmatmul.mubr.msk.bf16.vlgmr.msra.gmra.mrb[4].mxu1 %vm2824_vm3, %v2828_v41 }
 0x26a   :  { %1956 = vmatpush1.bf16.msra.mxu1 %v2202_v47  ;;  %2340 = vmatprep.mubr.msk.bf16.mxu1 %vm2818_vm2, %v2822_v39  ;;  %v2323_v47 = vcombine.high %v1185_v44, %v1189_v45  ;;  %v1178_v45 = vld [vmem:[#allocation7 + $0x398] sm:$0xff] }
 0x26b   :  { %1957 = vmatprep.subr.bf16.mxu1 %v2211_v48  ;;  %v1066_v48 = vld [vmem:[#allocation7 + $0x18] sm:$0xff] }
 0x26c   :  { %v2204_v54 = vcombine.low %v1066_v48, %v1070_v49 }
 0x26e   :  { %1958 = vmatpush1.bf16.msra.mxu1 %v2210_v51  ;;  %v2205_v51 = vcombine.high %v1066_v48, %v1070_v49  ;;  %v1186_v49 = vld [vmem:[#allocation7 + $0x3d8] sm:$0xff] }
 0x26f   :  { %1959 = vmatprep.subr.bf16.mxu1 %v2219_v52  ;;  %v1074_v52 = vld [vmem:[#allocation7 + $0x58] sm:$0xff] }
 0x270   :  { %v2212_v58 = vcombine.low %v1074_v52, %v1078_v53 }
 0x272   :  { %1960 = vmatpush1.bf16.msra.mxu1 %v2218_v55  ;;  %v2213_v55 = vcombine.high %v1074_v52, %v1078_v53 }
 0x273   :  { %1961 = vmatprep.subr.bf16.mxu1 %v2227_v56  ;;  %v1082_v56 = vld [vmem:[#allocation7 + $0x98] sm:$0xff] }
 0x274   :  { %v2220_v62 = vcombine.low %v1082_v56, %v1086_v57 }
 0x276   :  { %1962 = vmatpush1.bf16.msra.mxu1 %v2226_v59  ;;  %v2221_v59 = vcombine.high %v1082_v56, %v1086_v57 }
 0x277   :  { %1963 = vmatprep.subr.bf16.mxu1 %v2235_v60  ;;  %v1090_v60 = vld [vmem:[#allocation7 + $0xd8] sm:$0xff] }
 0x278   :  { %v2228_v2 = vcombine.low %v1090_v60, %v1094_v61 }
 0x27a   :  { %1964 = vmatpush1.bf16.msra.mxu1 %v2234_v63  ;;  %v2229_v63 = vcombine.high %v1090_v60, %v1094_v61 }
 0x27b   :  { %1965 = vmatprep.subr.bf16.mxu1 %v2243_v0  ;;  %v1098_v0 = vld [vmem:[#allocation7 + $0x118] sm:$0xff] }
 0x27c   :  { %v2236_v38 = vcombine.low %v1098_v0, %v1102_v1 }
 0x27e   :  { %1966 = vmatpush1.bf16.msra.mxu1 %v2242_v3  ;;  %v2237_v3 = vcombine.high %v1098_v0, %v1102_v1 }
 0x27f   :  { %1967 = vmatprep.subr.bf16.mxu1 %v2251_v4  ;;  %v1106_v4 = vld [vmem:[#allocation7 + $0x158] sm:$0xff] }
 0x282   :  { %1968 = vmatpush1.bf16.msra.mxu1 %v2250_v8  ;;  %v1118_v8 = vld [vmem:[#allocation7 + $0x1b8] sm:$0xff] }
 0x283   :  { %1969 = vmatprep.subr.bf16.mxu1 %v2259_v9  ;;  %v2244_v9 = vcombine.low %v1106_v4, %v1110_v5  ;;  %v2253_v10 = vcombine.high %v1114_v7, %v1118_v8 }
 0x286   :  { %1970 = vmatpush1.bf16.msra.mxu1 %v2258_v12  ;;  %v1126_v12 = vld [vmem:[#allocation7 + $0x1f8] sm:$0xff] }
 0x287   :  { %1971 = vmatprep.subr.bf16.mxu1 %v2267_v13  ;;  %v2252_v13 = vcombine.low %v1114_v7, %v1118_v8  ;;  %v2261_v14 = vcombine.high %v1122_v11, %v1126_v12 }
 0x28a   :  { %1972 = vmatpush1.bf16.msra.mxu1 %v2266_v16  ;;  %v1134_v16 = vld [vmem:[#allocation7 + $0x238] sm:$0xff] }
 0x28b   :  { %1973 = vmatprep.subr.bf16.mxu1 %v2275_v17  ;;  %v2260_v17 = vcombine.low %v1122_v11, %v1126_v12  ;;  %v2269_v20 = vcombine.high %v1130_v15, %v1134_v16 }
 0x28e   :  { %1974 = vmatpush1.bf16.msra.mxu1 %v2274_v23  ;;  %v1142_v23 = vld [vmem:[#allocation7 + $0x278] sm:$0xff] }
 0x28f   :  { %1975 = vmatprep.subr.bf16.mxu1 %v2283_v24  ;;  %v2268_v24 = vcombine.low %v1130_v15, %v1134_v16  ;;  %v2277_v25 = vcombine.high %v1138_v22, %v1142_v23  ;;  %v1223_v15 = vsub.s32 7, %v2801_v18 }
 0x292   :  { %1976 = vmatpush1.bf16.msra.mxu1 %v2282_v27  ;;  %v1150_v27 = vld [vmem:[#allocation7 + $0x2b8] sm:$0xff] }
 0x293   :  { %1977 = vmatprep.subr.bf16.mxu1 %v2291_v28  ;;  %v2276_v28 = vcombine.low %v1138_v22, %v1142_v23  ;;  %v2285_v29 = vcombine.high %v1146_v26, %v1150_v27 }
 0x296   :  { %1978 = vmatpush1.bf16.msra.mxu1 %v2290_v31  ;;  %v1158_v31 = vld [vmem:[#allocation7 + $0x2f8] sm:$0xff] }
 0x297   :  { %1979 = vmatprep.subr.bf16.mxu1 %v2299_v32  ;;  %v2284_v32 = vcombine.low %v1146_v26, %v1150_v27  ;;  %v2293_v33 = vcombine.high %v1154_v30, %v1158_v31 }
 0x29a   :  { %1980 = vmatpush1.bf16.msra.mxu1 %v2298_v35  ;;  %v1166_v35 = vld [vmem:[#allocation7 + $0x338] sm:$0xff] }
 0x29b   :  { %1981 = vmatprep.subr.bf16.mxu1 %v2307_v36  ;;  %v2292_v36 = vcombine.low %v1154_v30, %v1158_v31  ;;  %v2301_v37 = vcombine.high %v1162_v34, %v1166_v35 }
 0x29e   :  { %1982 = vmatpush1.bf16.msra.mxu1 %v2306_v43  ;;  %v1174_v43 = vld [vmem:[#allocation7 + $0x378] sm:$0xff] }
 0x29f   :  { %1983 = vmatprep.subr.bf16.mxu1 %v2315_v6  ;;  %v2300_v6 = vcombine.low %v1162_v34, %v1166_v35  ;;  %v2309_v44 = vcombine.high %v1170_v42, %v1174_v43 }
 0x2a2   :  { %1984 = vmatpush1.bf16.msra.mxu1 %v2314_v46  ;;  %v1182_v46 = vld [vmem:[#allocation7 + $0x3b8] sm:$0xff] }
 0x2a3   :  { %1985 = vmatprep.subr.bf16.mxu1 %v2323_v47  ;;  %v2308_v47 = vcombine.low %v1170_v42, %v1174_v43  ;;  %v2317_v48 = vcombine.high %v1178_v45, %v1182_v46 }
 0x2a6   :  { %1986 = vmatpush1.bf16.msra.mxu1 %v2322_v50  ;;  %v1190_v50 = vld [vmem:[#allocation7 + $0x3f8] sm:$0xff] }
 0x2a7   :  { %1996 = vmatprep.subr.bf16.mxu1 %v2205_v51  ;;  %v2316_v51 = vcombine.low %v1178_v45, %v1182_v46  ;;  %v2325_v52 = vcombine.high %v1186_v49, %v1190_v50  ;;  %v2324_v53 = vcombine.low %v1186_v49, %v1190_v50 }
 0x2a9   :  { %2343 = vmatmul.mubr.msk.bf16.vlgmr.msra.gmra.mrb[8].mxu1 %vm2824_vm3, %v2828_v41 }
 0x2aa   :  { %1997 = vmatpush1.bf16.msra.mxu1 %v2204_v54  ;;  %2346 = vmatprep.mubr.msk.bf16.mxu1 %vm2818_vm2, %v2822_v39  ;;  %v2245_v39 = vcombine.high %v1106_v4, %v1110_v5  ;;  %v1191_v54 = vld [vmem:[#allocation8] sm:$0xff]  ;;  %v1211_v5 = vsub.s32 4, %v2801_v18 }
 0x2ab   :  { %1998 = vmatprep.subr.bf16.mxu1 %v2213_v55  ;;  %v1196_v55 = vrot.slane %v1191_v54, %v211_v19  ;;  %v1200_v56 = vrot.slane %v1191_v54, %v215_v21  ;;  %v1208_v0 = vrot.slane %v1191_v54, %v1207_v40 }
 0x2ae   :  { %1999 = vmatpush1.bf16.msra.mxu1 %v2212_v58 }
 0x2af   :  { %2000 = vmatprep.subr.bf16.mxu1 %v2221_v59 }
 0x2b2   :  { %2001 = vmatpush1.bf16.msra.mxu1 %v2220_v62 }
 0x2b3   :  { %2002 = vmatprep.subr.bf16.mxu1 %v2229_v63  ;;  %v1203_v63 = vsub.s32 2, %v2801_v18 }
 0x2b6   :  { %2003 = vmatpush1.bf16.msra.mxu1 %v2228_v2 }
 0x2b7   :  { %2004 = vmatprep.subr.bf16.mxu1 %v2237_v3 }
 0x2ba   :  { %2005 = vmatpush1.bf16.msra.mxu1 %v2236_v38  ;;  %v1215_v38 = vsub.s32 5, %v2801_v18 }
 0x2bb   :  { %2006 = vmatprep.subr.bf16.mxu1 %v2245_v39  ;;  %v1212_v39 = vrot.slane %v1191_v54, %v1211_v5 }
 0x2bc   :  { %v1216_v7 = vrot.slane %v1191_v54, %v1215_v38 }
 0x2be   :  { %2007 = vmatpush1.bf16.msra.mxu1 %v2244_v9 }
 0x2bf   :  { %2008 = vmatprep.subr.bf16.mxu1 %v2253_v10 }
 0x2c2   :  { %2009 = vmatpush1.bf16.msra.mxu1 %v2252_v13 }
 0x2c3   :  { %2010 = vmatprep.subr.bf16.mxu1 %v2261_v14  ;;  %v1219_v14 = vsub.s32 6, %v2801_v18 }
 0x2c5   :  { %v1220_v16 = vrot.slane %v1191_v54, %v1219_v14 }
 0x2c6   :  { %2011 = vmatpush1.bf16.msra.mxu1 %v2260_v17  ;;  %v1224_v17 = vrot.slane %v1191_v54, %v1223_v15 }
 0x2c7   :  { %2012 = vmatprep.subr.bf16.mxu1 %v2269_v20 }
 0x2ca   :  { %2013 = vmatpush1.bf16.msra.mxu1 %v2268_v24 }
 0x2cb   :  { %2014 = vmatprep.subr.bf16.mxu1 %v2277_v25 }
 0x2ce   :  { %2015 = vmatpush1.bf16.msra.mxu1 %v2276_v28 }
 0x2cf   :  { %2016 = vmatprep.subr.bf16.mxu1 %v2285_v29 }
 0x2d2   :  { %2017 = vmatpush1.bf16.msra.mxu1 %v2284_v32 }
 0x2d3   :  { %2018 = vmatprep.subr.bf16.mxu1 %v2293_v33 }
 0x2d6   :  { %2019 = vmatpush1.bf16.msra.mxu1 %v2292_v36 }
 0x2d7   :  { %2020 = vmatprep.subr.bf16.mxu1 %v2301_v37 }
 0x2da   :  { %2021 = vmatpush1.bf16.msra.mxu1 %v2300_v6 }
 0x2db   :  { %2022 = vmatprep.subr.bf16.mxu1 %v2309_v44 }
 0x2de   :  { %2023 = vmatpush1.bf16.msra.mxu1 %v2308_v47 }
 0x2df   :  { %2024 = vmatprep.subr.bf16.mxu1 %v2317_v48 }
 0x2e2   :  { %2025 = vmatpush1.bf16.msra.mxu1 %v2316_v51 }
 0x2e3   :  { %2026 = vmatprep.subr.bf16.mxu1 %v2325_v52 }
 0x2e6   :  { %2027 = vmatpush1.bf16.msra.mxu1 %v2324_v53 }
 0x2e9   :  { %2349 = vmatmul.mubr.msk.bf16.vlgmr.msra.gmra.mrb[12].mxu1 %vm2824_vm3, %v2828_v41  ;;  %v1204_v41 = vrot.slane %v1191_v54, %v1203_v63 }
 0x2fc   :  { %v1907_v57 = vpop.f32.mrb[0].mxu1 }
 0x2fd   :  { %v1908_v58 = vadd.f32 %v1907_v57, %v1196_v55  ;;  %v1909_v59 = vpop.f32.mrb[1].mxu1 }
 0x2fe   :  { %v1910_v60 = vadd.f32 %v1909_v59, %v1200_v56  ;;  %v1911_v61 = vpop.f32.mrb[2].mxu1 }
 0x2ff   :  { %2037 = vst [vmem:[#allocation10] sm:$0xff] %v1908_v58  ;;  %v1912_v62 = vpop.f32.mrb[3].mxu1 }
 0x300   :  { %2038 = vst [vmem:[#allocation10 + $0x8] sm:$0xff] %v1910_v60 }
 0x33c   :  { %v1948_v1 = vpop.f32.mrb[4].mxu1 }
 0x33d   :  { %v1949_v2 = vadd.f32 %v1948_v1, %v1204_v41  ;;  %v1950_v19 = vpop.f32.mrb[5].mxu1 }
 0x33e   :  { %v1951_v3 = vadd.f32 %v1950_v19, %v1208_v0  ;;  %v1952_v4 = vpop.f32.mrb[6].mxu1 }
 0x33f   :  { %2039 = vst [vmem:[#allocation10 + $0x10] sm:$0xff] %v1949_v2  ;;  %v1953_v21 = vpop.f32.mrb[7].mxu1 }
 0x340   :  { %2040 = vst [vmem:[#allocation10 + $0x18] sm:$0xff] %v1951_v3 }
 0x37c   :  { %v1989_v8 = vpop.f32.mrb[8].mxu1 }
 0x37d   :  { %v1990_v9 = vadd.f32 %v1989_v8, %v1212_v39  ;;  %v1991_v10 = vpop.f32.mrb[9].mxu1 }
 0x37e   :  { %v1992_v11 = vadd.f32 %v1991_v10, %v1216_v7  ;;  %v1993_v12 = vpop.f32.mrb[10].mxu1 }
 0x37f   :  { %2041 = vst [vmem:[#allocation10 + $0x20] sm:$0xff] %v1990_v9  ;;  %v1994_v13 = vpop.f32.mrb[11].mxu1 }
 0x380   :  { %2042 = vst [vmem:[#allocation10 + $0x28] sm:$0xff] %v1992_v11 }
 0x3bc   :  { %v2030_v20 = vpop.f32.mrb[12].mxu1 }
 0x3bd   :  { %v2031_v22 = vadd.f32 %v2030_v20, %v1220_v16  ;;  %v2032_v23 = vpop.f32.mrb[13].mxu1 }
 0x3be   :  { %v2033_v24 = vadd.f32 %v2032_v23, %v1224_v17  ;;  %v2034_v25 = vpop.f32.mrb[14].mxu1 }
 0x3bf   :  { %2043 = vst [vmem:[#allocation10 + $0x30] sm:$0xff] %v2031_v22  ;;  %v2035_v26 = vpop.f32.mrb[15].mxu1 }
 0x3c0   :  { %2044 = vst [vmem:[#allocation10 + $0x38] sm:$0xff] %v2033_v24 }
 0x3c1   :  { %2672 = shalt.err (!%p2669_p8)
}
 0x3c2   :  { %s2673_s29 = scalar_lea.hbm %s2882_s6, 1024 }
 0x3c3   :  { %p2674_p9 = scmp.ne.s32.totalorder %s2882_s6, %s2673_s29  ;;  %p2677_p10 = scmp.lt.u32.totalorder %s2673_s29, %s2882_s6 }
 0x3c5   :  { %p2679_p11 = pnand %p2677_p10, %p2674_p9 }
 0x3c7   :  { %2682 = shalt.err (!%p2679_p11)
}
 0x3c8   :  { %2054 = dma.vmem_to_hbm [thread:$0]  %s2052_s5, 1024, %s2882_s6, [#allocation4]  }
 0x3c9   :  { %2689 = dma.done.wait [#allocation4], 1024  }
 0x3ca   :  { %2690 = vsyncadd [#allocation4], 4294966272 }
 0x3cb   :  { %2058 = vsyncpa [#allocation3], 1 }
 0x3cc   :  { %2059 = vsyncpa [#allocation6], 1 }
 0x3cd   :  { %2060 = vsyncpa [#allocation9], 1 }
 0x3ce   :  { %2061 = vsyncpa [#allocation4], 1 }

</bundles_post_ra>
